<compile_context>
chip_gen: v5e
topology: v5e:2x2
jax: 0.10.0
libtpu: 0.0.40
codegen_flags: <defaults>
</compile_context>

<pallas_src>
import numpy as np
import jax
import jax.numpy as jnp
from jax import lax
from jax.experimental import pallas as pl
from jax.experimental.pallas import tpu as pltpu

LAMBD = 0.025
CG_ITERS = 50
RHO_TOL = 1e-15
# MXU operand dtype (f32 accumulate).  jnp.bfloat16 per perf review; switch to
# jnp.float32 for exact-f32 validation against the PyTorch reference.
MATMUL_DTYPE = jnp.bfloat16


# ------------------------------------------------------------------ glue -----
def _round_up(n, m):
    return ((n + m - 1) // m) * m


def _dft_cos_sin(n, n_pad):
    """cos/sin of the n-point DFT matrix, zero-embedded in (n_pad, n_pad)."""
    idx = np.arange(n)
    ang = -2.0 * np.pi * (np.outer(idx, idx) % n) / float(n)
    c = np.zeros((n_pad, n_pad), np.float32)
    s = np.zeros((n_pad, n_pad), np.float32)
    c[:n, :n] = np.cos(ang)
    s[:n, :n] = np.sin(ang)
    return c, s


def _center_crop_hw(x, out_h, out_w):
    """torchvision-style center crop on the last two dims (pads if larger)."""
    h, w = x.shape[-2], x.shape[-1]
    if out_h > h or out_w > w:
        pad_l = max((out_w - w) // 2, 0)
        pad_t = max((out_h - h) // 2, 0)
        pad_r = max(out_w - w - pad_l, 0)
        pad_b = max(out_h - h - pad_t, 0)
        pad = [(0, 0)] * (x.ndim - 2) + [(pad_t, pad_b), (pad_l, pad_r)]
        x = jnp.pad(x, pad)
        h, w = x.shape[-2], x.shape[-1]
    top = int(round((h - out_h) / 2.0))
    left = int(round((w - out_w) / 2.0))
    return x[..., top:top + out_h, left:left + out_w]


# ---------------------------------------------------------------- kernel -----
def _make_cg_kernel(Hp, Wp):
    def kernel(kk_ref, x0_ref, r0_ref, b1_ref, b2_ref, b3_ref, b4_ref, out_ref):
        kk = kk_ref[0]                       # (Hp, Wp) f32  |k_fft|^2
        x0 = x0_ref[0]                       # (Hp, Wp) f32
        r0 = r0_ref[0]                       # (Hp, Wp) f32
        b1 = b1_ref[...]                     # (Wp, 2Wp)   [Cw, Sw]
        b2 = b2_ref[...]                     # (2Hp, 2Hp)  [[Ch,-Sh],[Sh,Ch]]
        b3 = b3_ref[...]                     # (2Hp, 2Hp)  [[Ch,Sh],[-Sh,Ch]]/(HW)
        b4 = b4_ref[...]                     # (2Wp, Wp)   [Cw; Sw]

        # Loop-invariant vertical copy of |k_fft|^2 for the stacked [Re; Im]
        # representation used between the two row-transform matmuls.
        kk2 = jnp.concatenate([kk, kk], axis=0)          # (2Hp, Wp) f32

        def mm(a, b):
            # bf16 MXU operands, f32 accumulation (elementwise math stays f32).
            return jnp.dot(a.astype(MATMUL_DTYPE), b.astype(MATMUL_DTYPE),
                           preferred_element_type=jnp.float32)

        def apply_A(p):
            """real(ifft2(fft2(p) * kk)) + LAMBD * p via 4 block matmuls."""
            # column FFT of the real plane: p @ [Cw, Sw] -> [Sr, Si] (horizontal)
            h1 = mm(p, b1)                                           # (Hp, 2Wp)
            # tile-aligned flip horizontal -> vertical [Sr; Si]
            v1 = jnp.concatenate([h1[:, :Wp], h1[:, Wp:]], axis=0)   # (2Hp, Wp)
            # row FFT: [[Ch,-Sh],[Sh,Ch]] @ [Sr; Si] -> [Tr; Ti]
            t = mm(b2, v1)                                           # (2Hp, Wp)
            # elementwise multiply by the (exactly real) |k_fft|^2, in f32
            q = kk2 * t                                              # (2Hp, Wp)
            # inverse row FFT (scaled by 1/(H*W)): [[Ch,Sh],[-Sh,Ch]]/(HW) @ .
            u = mm(b3, q)                                            # (2Hp, Wp)
            # tile-aligned flip vertical -> horizontal [Ur, Ui]
            hu = jnp.concatenate([u[:Hp, :], u[Hp:, :]], axis=1)     # (Hp, 2Wp)
            # real part of the inverse column FFT: Ur@Cw + Ui@Sw
            ap = mm(hu, b4)                                          # (Hp, Wp)
            return ap + LAMBD * p

        def body(i, carry):
            x, r, p, rho, rho_1 = carry          # rho, rho_1: (1, 1) f32
            # PyTorch `break` when rho < 1e-15 -> freeze x/r/rho via alpha = 0.
            active = rho >= RHO_TOL
            # 0-based reference loop: p = r for i in {0, 1}, else r + beta*p.
            beta = jnp.where(i > 1, rho * pl.reciprocal(rho_1), 0.0)
            p = r + beta * p
            q = apply_A(p)
            pq = jnp.sum(p * q, keepdims=True)                       # (1, 1)
            alpha = jnp.where(active, rho * pl.reciprocal(pq),
                              jnp.zeros_like(rho))
            x = x + alpha * p
            r = r - alpha * q
            # Fuse the next iteration's rho into this one (shortens the serial
            # scalar chain between matmul bursts).
            rho_next = jnp.sum(r * r, keepdims=True)
            rho_1 = jnp.where(active, rho, rho_1)
            rho = jnp.where(active, rho_next, rho)
            return x, r, p, rho, rho_1

        rho0 = jnp.sum(r0 * r0, keepdims=True)
        # unroll=1: iterations are serially dependent through alpha/beta, so
        # unrolling would only raise vreg/VMEM pressure.
        x_fin, _, _, _, _ = lax.fori_loop(
            0, CG_ITERS, body,
            (x0, r0, jnp.zeros_like(r0), rho0, jnp.ones_like(rho0)))
        out_ref[0] = x_fin

    return kernel


# --------------------------------------------------------------- wrapper -----
def vp_layer_conjgrad(y_pad, y_old_shape, k):
    """y_pad: (N, C, H, W) f32, k: (1, 1, kh, kw) f32, y_old_shape: (h0, w0)."""
    N, C, H, W = (int(d) for d in y_pad.shape)
    B = N * C
    y = jnp.asarray(y_pad, jnp.float32).reshape(B, H, W)

    # ---- one-time Fourier-domain setup (XLA, outside the kernel) ------------
    k_c = _center_crop_hw(jnp.asarray(k, jnp.float32), H, W)
    k_c = jnp.fft.ifftshift(k_c, axes=(-2, -1)).reshape(H, W)
    y_fft = jnp.fft.fft2(y)                                        # (B, H, W)
    k_fft = jnp.fft.fft2(k_c)                                      # (H, W)
    kk = k_fft.real * k_fft.real + k_fft.imag * k_fft.imag         # |k_fft|^2
    x_fft = y_fft * jnp.conj(k_fft) / (kk + LAMBD)
    ax = x_fft * kk + LAMBD * x_fft
    b = y_fft * jnp.conj(k_fft)
    # Reference uses torch.abs (not .real) for both x0 and r0.
    r0 = jnp.abs(jnp.fft.ifft2(b - ax)).astype(jnp.float32)        # (B, H, W)
    x0 = jnp.abs(jnp.fft.ifft2(x_fft)).astype(jnp.float32)         # (B, H, W)
    kk = jnp.broadcast_to(kk.astype(jnp.float32)[None], (B, H, W))

    # ---- lane/sublane-dense zero padding (exact, see header) ----------------
    Hp = max(8, _round_up(H, 8))
    Wp = max(128, _round_up(W, 128))
    pad3 = lambda a: jnp.pad(a, ((0, 0), (0, Hp - H), (0, Wp - W)))
    kk_p, x0_p, r0_p = pad3(kk), pad3(x0), pad3(r0)

    # ---- block DFT matrices (built once, cast once to the MXU dtype) --------
    ch, sh = _dft_cos_sin(H, Hp)
    cw, sw = _dft_cos_sin(W, Wp)
    scale = np.float32(1.0 / (H * W))                 # full ifft2 normalisation
    b1 = np.concatenate([cw, sw], axis=1)             # (Wp, 2Wp)   p @ Fw
    b2 = np.block([[ch, -sh], [sh, ch]])              # (2Hp, 2Hp)  Fh @ .
    b3 = np.block([[ch, sh], [-sh, ch]]) * scale      # (2Hp, 2Hp)  conj(Fh)/(HW) @ .
    b4 = np.concatenate([cw, sw], axis=0)             # (2Wp, Wp)   Re(. @ conj(Fw))
    b1, b2, b3, b4 = (jnp.asarray(m, MATMUL_DTYPE) for m in (b1, b2, b3, b4))

    kernel = _make_cg_kernel(Hp, Wp)

    # ---- generation-aware scoped-VMEM budget (~15% headroom) ----------------
    try:
        info = pltpu.get_tpu_info()
        vmem_cap = int(getattr(info, "vmem_capacity_bytes", 64 * 1024 * 1024))
    except Exception:
        vmem_cap = 64 * 1024 * 1024
    vmem_limit = int(vmem_cap * 0.85)

    # ---- advisory cost hint for XLA scheduling around the custom call -------
    per_iter_flops = 8 * Hp * Wp * Wp + 16 * Hp * Hp * Wp + 12 * Hp * Wp
    flops = int(B * CG_ITERS * per_iter_flops)
    const_elems = Wp * 2 * Wp + 2 * (2 * Hp) * (2 * Hp) + 2 * Wp * Wp
    bytes_accessed = int(4 * 4 * B * Hp * Wp
                         + jnp.dtype(MATMUL_DTYPE).itemsize * const_elems)

    plane_spec = pl.BlockSpec((1, Hp, Wp), lambda bidx: (bidx, 0, 0))
    const_spec = lambda s: pl.BlockSpec(s, lambda bidx: (0, 0))

    x_full = pl.pallas_call(
        kernel,
        out_shape=jax.ShapeDtypeStruct((B, Hp, Wp), jnp.float32),
        grid=(B,),
        in_specs=[plane_spec, plane_spec, plane_spec,
                  const_spec((Wp, 2 * Wp)),
                  const_spec((2 * Hp, 2 * Hp)),
                  const_spec((2 * Hp, 2 * Hp)),
                  const_spec((2 * Wp, Wp))],
        out_specs=plane_spec,
        compiler_params=pltpu.CompilerParams(
            dimension_semantics=("parallel",),   # planes shard across TCs (v7x)
            vmem_limit_bytes=vmem_limit),
        cost_estimate=pl.CostEstimate(flops=flops, transcendentals=0,
                                      bytes_accessed=bytes_accessed),
    )(kk_p, x0_p, r0_p, b1, b2, b3, b4)

    # TODO(synk): for B > 1 this kernel runs an independent CG per plane; the
    # reference's torch.sum would couple planes (it is only used with N=C=1).
    x = x_full[:, :H, :W].reshape(N, C, H, W)
    return _center_crop_hw(x, int(y_old_shape[0]), int(y_old_shape[1]))


# ------------------------------------------------------------------ main -----
if __name__ == "__main__":
    key = jax.random.PRNGKey(0)
    k1, k2 = jax.random.split(key)

    H = W = 32
    y_pad = jax.random.uniform(k1, (1, 1, H, W), jnp.float32)
    k_raw = jax.random.uniform(k2, (1, 1, 44, 44), jnp.float32)
    k_raw = k_raw / jnp.sum(k_raw)                  # blur-kernel-like (sums to 1)
    y_old_shape = (24, 24)

    out = vp_layer_conjgrad(y_pad, y_old_shape, k_raw)
    out = jax.block_until_ready(out)

    assert out.shape == (1, 1, 24, 24), out.shape
    assert bool(jnp.all(jnp.isfinite(out)))
    print("KERNEL_OK")
</pallas_src>

<mosaic_0001>
module attributes {stable_mosaic.version = 11 : i64} {
  func.func @kernel(%arg0: i32, %arg1: memref<1x32x128xf32, #tpu.memory_space<vmem>>, %arg2: memref<1x32x128xf32, #tpu.memory_space<vmem>>, %arg3: memref<1x32x128xf32, #tpu.memory_space<vmem>>, %arg4: memref<128x256xbf16, #tpu.memory_space<vmem>>, %arg5: memref<64x64xbf16, #tpu.memory_space<vmem>>, %arg6: memref<64x64xbf16, #tpu.memory_space<vmem>>, %arg7: memref<256x128xbf16, #tpu.memory_space<vmem>>, %arg8: memref<1x32x128xf32, #tpu.memory_space<vmem>>) attributes {dimension_semantics = [#tpu.dimension_semantics<parallel>], iteration_bounds = array<i64: 1>, scalar_prefetch = 0 : i64, scratch_operands = 0 : i64, tpu.core_type = #tpu.core_type<tc>, window_params = [{transform_indices = @transform_0, window_bounds = array<i64: 1, 32, 128>}, {transform_indices = @transform_1, window_bounds = array<i64: 1, 32, 128>}, {transform_indices = @transform_2, window_bounds = array<i64: 1, 32, 128>}, {pipeline_mode = #tpu.pipeline_mode<synchronous>, transform_indices = @transform_3, window_bounds = array<i64: 128, 256>}, {pipeline_mode = #tpu.pipeline_mode<synchronous>, transform_indices = @transform_4, window_bounds = array<i64: 64, 64>}, {pipeline_mode = #tpu.pipeline_mode<synchronous>, transform_indices = @transform_5, window_bounds = array<i64: 64, 64>}, {pipeline_mode = #tpu.pipeline_mode<synchronous>, transform_indices = @transform_6, window_bounds = array<i64: 256, 128>}, {transform_indices = @transform_7, window_bounds = array<i64: 1, 32, 128>}]} {
    %c0 = arith.constant 0 : index
    %c0_0 = arith.constant 0 : index
    %c0_1 = arith.constant 0 : index
    %0 = vector.load %arg1[%c0, %c0_0, %c0_1] : memref<1x32x128xf32, #tpu.memory_space<vmem>>, vector<1x32x128xf32>
    %1 = vector.shape_cast %0 : vector<1x32x128xf32> to vector<32x128xf32>
    %c0_2 = arith.constant 0 : index
    %c0_3 = arith.constant 0 : index
    %c0_4 = arith.constant 0 : index
    %2 = vector.load %arg2[%c0_2, %c0_3, %c0_4] : memref<1x32x128xf32, #tpu.memory_space<vmem>>, vector<1x32x128xf32>
    %3 = vector.shape_cast %2 : vector<1x32x128xf32> to vector<32x128xf32>
    %c0_5 = arith.constant 0 : index
    %c0_6 = arith.constant 0 : index
    %c0_7 = arith.constant 0 : index
    %4 = vector.load %arg3[%c0_5, %c0_6, %c0_7] : memref<1x32x128xf32, #tpu.memory_space<vmem>>, vector<1x32x128xf32>
    %5 = vector.shape_cast %4 : vector<1x32x128xf32> to vector<32x128xf32>
    %c0_8 = arith.constant 0 : index
    %c0_9 = arith.constant 0 : index
    %6 = vector.load %arg4[%c0_8, %c0_9] : memref<128x256xbf16, #tpu.memory_space<vmem>>, vector<128x256xbf16>
    %c0_10 = arith.constant 0 : index
    %c0_11 = arith.constant 0 : index
    %7 = vector.load %arg5[%c0_10, %c0_11] : memref<64x64xbf16, #tpu.memory_space<vmem>>, vector<64x64xbf16>
    %c0_12 = arith.constant 0 : index
    %c0_13 = arith.constant 0 : index
    %8 = vector.load %arg6[%c0_12, %c0_13] : memref<64x64xbf16, #tpu.memory_space<vmem>>, vector<64x64xbf16>
    %c0_14 = arith.constant 0 : index
    %c0_15 = arith.constant 0 : index
    %9 = vector.load %arg7[%c0_14, %c0_15] : memref<256x128xbf16, #tpu.memory_space<vmem>>, vector<256x128xbf16>
    %10 = tpu.concatenate %1, %1 in 0 : vector<32x128xf32>, vector<32x128xf32> -> vector<64x128xf32>
    %11 = arith.mulf %5, %5 : vector<32x128xf32>
    %12 = vector.shape_cast %11 : vector<32x128xf32> to vector<1x32x128xf32>
    %cst = arith.constant dense<0.000000e+00> : vector<1xf32>
    %13 = vector.multi_reduction <add>, %12, %cst [1, 2] : vector<1x32x128xf32> to vector<1xf32>
    %14 = vector.shape_cast %13 : vector<1xf32> to vector<1x1x1xf32>
    %15 = vector.extract %14[0, 0, 0] : f32 from vector<1x1x1xf32>
    %16 = vector.broadcast %15 : f32 to vector<1x1xf32>
    %cst_16 = arith.constant 0.000000e+00 : f32
    %17 = vector.broadcast %cst_16 : f32 to vector<32x128xf32>
    %cst_17 = arith.constant 1.000000e+00 : f32
    %18 = vector.broadcast %cst_17 : f32 to vector<1x1xf32>
    %c0_i32 = arith.constant 0 : i32
    %c50_i32 = arith.constant 50 : i32
    %19 = arith.addi %c0_i32, %c50_i32 : i32
    %c1_i32 = arith.constant 1 : i32
    %20:5 = scf.for %arg9 = %c0_i32 to %19 step %c1_i32 iter_args(%arg10 = %3, %arg11 = %5, %arg12 = %17, %arg13 = %16, %arg14 = %18) -> (vector<32x128xf32>, vector<32x128xf32>, vector<32x128xf32>, vector<1x1xf32>, vector<1x1xf32>)  : i32 {
      %cst_22 = arith.constant 1.000000e-15 : f32
      %24 = vector.broadcast %cst_22 : f32 to vector<1x1xf32>
      %25 = arith.cmpf oge, %arg13, %24 : vector<1x1xf32>
      %c1_i32_23 = arith.constant 1 : i32
      %26 = arith.cmpi sgt, %arg9, %c1_i32_23 : i32
      %27 = tpu.reciprocal %arg14 : vector<1x1xf32> -> vector<1x1xf32>
      %28 = arith.mulf %arg13, %27 : vector<1x1xf32>
      %cst_24 = arith.constant 0.000000e+00 : f32
      %29 = vector.broadcast %cst_24 : f32 to vector<1x1xf32>
      %30 = arith.select %26, %28, %29 : vector<1x1xf32>
      %31 = vector.broadcast %30 : vector<1x1xf32> to vector<32x128xf32>
      %32 = arith.mulf %31, %arg12 : vector<32x128xf32>
      %33 = arith.addf %arg11, %32 : vector<32x128xf32>
      %34 = arith.truncf %33 : vector<32x128xf32> to vector<32x128xbf16>
      %cst_25 = arith.constant dense<0.000000e+00> : vector<32x256xf32>
      %35 = tpu.matmul %34, %6, %cst_25 {dimension_numbers = #tpu.dot_dimension_numbers<[1], [0], [0], [1], [0, 0, 1, 1], [], []>} : vector<32x128xbf16>, vector<128x256xbf16>, vector<32x256xf32> -> vector<32x256xf32>
      %36 = vector.extract_strided_slice %35 {offsets = [0, 0], sizes = [32, 128], strides = [1, 1]} : vector<32x256xf32> to vector<32x128xf32>
      %37 = vector.extract_strided_slice %35 {offsets = [0, 128], sizes = [32, 128], strides = [1, 1]} : vector<32x256xf32> to vector<32x128xf32>
      %38 = tpu.concatenate %36, %37 in 0 : vector<32x128xf32>, vector<32x128xf32> -> vector<64x128xf32>
      %39 = arith.truncf %38 : vector<64x128xf32> to vector<64x128xbf16>
      %cst_26 = arith.constant dense<0.000000e+00> : vector<64x128xf32>
      %40 = tpu.matmul %7, %39, %cst_26 {dimension_numbers = #tpu.dot_dimension_numbers<[1], [0], [0], [1], [0, 0, 1, 1], [], []>} : vector<64x64xbf16>, vector<64x128xbf16>, vector<64x128xf32> -> vector<64x128xf32>
      %41 = arith.mulf %10, %40 : vector<64x128xf32>
      %42 = arith.truncf %41 : vector<64x128xf32> to vector<64x128xbf16>
      %cst_27 = arith.constant dense<0.000000e+00> : vector<64x128xf32>
      %43 = tpu.matmul %8, %42, %cst_27 {dimension_numbers = #tpu.dot_dimension_numbers<[1], [0], [0], [1], [0, 0, 1, 1], [], []>} : vector<64x64xbf16>, vector<64x128xbf16>, vector<64x128xf32> -> vector<64x128xf32>
      %44 = vector.extract_strided_slice %43 {offsets = [0, 0], sizes = [32, 128], strides = [1, 1]} : vector<64x128xf32> to vector<32x128xf32>
      %45 = vector.extract_strided_slice %43 {offsets = [32, 0], sizes = [32, 128], strides = [1, 1]} : vector<64x128xf32> to vector<32x128xf32>
      %46 = tpu.concatenate %44, %45 in 1 : vector<32x128xf32>, vector<32x128xf32> -> vector<32x256xf32>
      %47 = arith.truncf %46 : vector<32x256xf32> to vector<32x256xbf16>
      %cst_28 = arith.constant dense<0.000000e+00> : vector<32x128xf32>
      %48 = tpu.matmul %47, %9, %cst_28 {dimension_numbers = #tpu.dot_dimension_numbers<[1], [0], [0], [1], [0, 0, 1, 1], [], []>} : vector<32x256xbf16>, vector<256x128xbf16>, vector<32x128xf32> -> vector<32x128xf32>
      %cst_29 = arith.constant 2.500000e-02 : f32
      %49 = vector.broadcast %cst_29 : f32 to vector<32x128xf32>
      %50 = arith.mulf %49, %33 : vector<32x128xf32>
      %51 = arith.addf %48, %50 : vector<32x128xf32>
      %52 = arith.mulf %33, %51 : vector<32x128xf32>
      %53 = vector.shape_cast %52 : vector<32x128xf32> to vector<1x32x128xf32>
      %cst_30 = arith.constant dense<0.000000e+00> : vector<1xf32>
      %54 = vector.multi_reduction <add>, %53, %cst_30 [1, 2] : vector<1x32x128xf32> to vector<1xf32>
      %55 = vector.shape_cast %54 : vector<1xf32> to vector<1x1x1xf32>
      %56 = vector.extract %55[0, 0, 0] : f32 from vector<1x1x1xf32>
      %57 = vector.broadcast %56 : f32 to vector<1x1xf32>
      %58 = tpu.reciprocal %57 : vector<1x1xf32> -> vector<1x1xf32>
      %59 = arith.mulf %arg13, %58 : vector<1x1xf32>
      %cst_31 = arith.constant 0.000000e+00 : f32
      %60 = vector.broadcast %cst_31 : f32 to vector<1x1xf32>
      %61 = arith.select %25, %59, %60 : vector<1x1xi1>, vector<1x1xf32>
      %62 = vector.broadcast %61 : vector<1x1xf32> to vector<32x128xf32>
      %63 = arith.mulf %62, %33 : vector<32x128xf32>
      %64 = arith.addf %arg10, %63 : vector<32x128xf32>
      %65 = vector.broadcast %61 : vector<1x1xf32> to vector<32x128xf32>
      %66 = arith.mulf %65, %51 : vector<32x128xf32>
      %67 = arith.subf %arg11, %66 : vector<32x128xf32>
      %68 = arith.mulf %67, %67 : vector<32x128xf32>
      %69 = vector.shape_cast %68 : vector<32x128xf32> to vector<1x32x128xf32>
      %cst_32 = arith.constant dense<0.000000e+00> : vector<1xf32>
      %70 = vector.multi_reduction <add>, %69, %cst_32 [1, 2] : vector<1x32x128xf32> to vector<1xf32>
      %71 = vector.shape_cast %70 : vector<1xf32> to vector<1x1x1xf32>
      %72 = vector.extract %71[0, 0, 0] : f32 from vector<1x1x1xf32>
      %73 = vector.broadcast %72 : f32 to vector<1x1xf32>
      %74 = arith.select %25, %arg13, %arg14 : vector<1x1xi1>, vector<1x1xf32>
      %75 = arith.select %25, %73, %arg13 : vector<1x1xi1>, vector<1x1xf32>
      scf.yield %64, %67, %33, %75, %74 : vector<32x128xf32>, vector<32x128xf32>, vector<32x128xf32>, vector<1x1xf32>, vector<1x1xf32>
    }
    %c50_i32_18 = arith.constant 50 : i32
    %c0_19 = arith.constant 0 : index
    %c0_20 = arith.constant 0 : index
    %c0_21 = arith.constant 0 : index
    %21 = vector.load %arg8[%c0_19, %c0_20, %c0_21] : memref<1x32x128xf32, #tpu.memory_space<vmem>>, vector<1x32x128xf32>
    %22 = vector.shape_cast %21 : vector<1x32x128xf32> to vector<32x128xf32>
    %23 = vector.shape_cast %20#0 : vector<32x128xf32> to vector<1x32x128xf32>
    tpu.vector_store %arg8[%c0_19, %c0_20, %c0_21], %23 {strides = array<i32>} : memref<1x32x128xf32, #tpu.memory_space<vmem>>, vector<1x32x128xf32>,
    return
  }
  func.func @transform_0(%arg0: i32) -> (i32, i32, i32) {
    %c0_i32 = arith.constant 0 : i32
    %c0_i32_0 = arith.constant 0 : i32
    %c0_i32_1 = arith.constant 0 : i32
    return %arg0, %c0_i32, %c0_i32_0 : i32, i32, i32
  }
  func.func @transform_1(%arg0: i32) -> (i32, i32, i32) {
    %c0_i32 = arith.constant 0 : i32
    %c0_i32_0 = arith.constant 0 : i32
    %c0_i32_1 = arith.constant 0 : i32
    return %arg0, %c0_i32, %c0_i32_0 : i32, i32, i32
  }
  func.func @transform_2(%arg0: i32) -> (i32, i32, i32) {
    %c0_i32 = arith.constant 0 : i32
    %c0_i32_0 = arith.constant 0 : i32
    %c0_i32_1 = arith.constant 0 : i32
    return %arg0, %c0_i32, %c0_i32_0 : i32, i32, i32
  }
  func.func @transform_3(%arg0: i32) -> (i32, i32) {
    %c0_i32 = arith.constant 0 : i32
    %c0_i32_0 = arith.constant 0 : i32
    %c0_i32_1 = arith.constant 0 : i32
    return %c0_i32, %c0_i32_0 : i32, i32
  }
  func.func @transform_4(%arg0: i32) -> (i32, i32) {
    %c0_i32 = arith.constant 0 : i32
    %c0_i32_0 = arith.constant 0 : i32
    %c0_i32_1 = arith.constant 0 : i32
    return %c0_i32, %c0_i32_0 : i32, i32
  }
  func.func @transform_5(%arg0: i32) -> (i32, i32) {
    %c0_i32 = arith.constant 0 : i32
    %c0_i32_0 = arith.constant 0 : i32
    %c0_i32_1 = arith.constant 0 : i32
    return %c0_i32, %c0_i32_0 : i32, i32
  }
  func.func @transform_6(%arg0: i32) -> (i32, i32) {
    %c0_i32 = arith.constant 0 : i32
    %c0_i32_0 = arith.constant 0 : i32
    %c0_i32_1 = arith.constant 0 : i32
    return %c0_i32, %c0_i32_0 : i32, i32
  }
  func.func @transform_7(%arg0: i32) -> (i32, i32, i32) {
    %c0_i32 = arith.constant 0 : i32
    %c0_i32_0 = arith.constant 0 : i32
    %c0_i32_1 = arith.constant 0 : i32
    return %arg0, %c0_i32, %c0_i32_0 : i32, i32, i32
  }
}

</mosaic_0001>

<bundles_post_ra>
// kernel: tpu_custom_call.1
= control target key start
LH: loop header
LB: loop body
LE: loop exit
PB: predicated region body
PF: predicated region fallthrough
CT: control target
= control target key end

     0   :  { %12 = vsyncpa [#allocation3], 0  ;;  %s2031_s0 = inlined_call_operand.hbm [shape: f32[1,32,128], index: 0, kind: input, shape index: {}]   ;;  %s2032_s1 = inlined_call_operand.hbm [shape: f32[1,32,128], index: 1, kind: input, shape index: {}]   ;;  %s2033_s2 = inlined_call_operand.hbm [shape: f32[1,32,128], index: 2, kind: input, shape index: {}]   ;;  %s2034_s3 = inlined_call_operand.hbm [shape: bf16[128,256], index: 3, kind: input, shape index: {}]   ;;  %s2035_s4 = inlined_call_operand.hbm [shape: bf16[64,64], index: 4, kind: input, shape index: {}]   ;;  %s2036_s5 = inlined_call_operand.hbm [shape: bf16[64,64], index: 5, kind: input, shape index: {}]   ;;  %s2037_s6 = inlined_call_operand.hbm [shape: bf16[256,128], index: 6, kind: input, shape index: {}]   ;;  %s2038_s7 = inlined_call_operand.hbm [shape: f32[1,32,128], index: 7, kind: output, shape index: {}]  }
   0x1   :  { %13 = vsyncpa [#allocation6], 0 }
   0x2   :  { %14 = vsyncpa [#allocation9], 0 }
   0x3   :  { %15 = vsyncpa [#allocation12], 0 }
   0x4   :  { %16 = vsyncpa [#allocation4], 0  ;;  %s34_s26 = sshll.u32 %s2032_s1, 4  ;;  %s1493_s27 = smov [#allocation5]   ;;  %s35_s26 = int_to_ptr.hbm [resolvable:$true] %s34_s26 }
   0x5   :  { %s36_s28 = sshll.u32 %s1493_s27, 4  ;;  %s60_s8 = sshll.u32 %s2034_s3, 4  ;;  %s37_s28 = int_to_ptr.vmem [resolvable:$true] %s36_s28  ;;  %s61_s8 = int_to_ptr.hbm [resolvable:$true] %s60_s8 }
   0x6   :  { %s1494_s9 = smov 128   ;;  %s1495_s10 = smov 8  }
   0x7   :  { %42 = dma.hbm_to_vmem [thread:$0]  %s35_s26, 512, %s37_s28, [#allocation6], %s1494_s9, %s1494_s9, %s1495_s10  }
   0x8   :  { %s1496_s11 = smov [#allocation8]   ;;  %s86_s14 = sshll.u32 %s2036_s5, 4  ;;  %s87_s14 = int_to_ptr.hbm [resolvable:$true] %s86_s14 }
   0x9   :  { %s62_s12 = sshll.u32 %s1496_s11, 4  ;;  %s1497_s3 = smov [#allocation11]   ;;  %s63_s12 = int_to_ptr.vmem [resolvable:$true] %s62_s12 }
   0xa   :  { %68 = dma.hbm_to_vmem [thread:$0]  %s61_s8, 2048, %s63_s12, [#allocation9], %s1494_s9, %s1494_s9, %s1495_s10  }
   0xb   :  { %s88_s15 = sshll.u32 %s1497_s3, 4  ;;  %s21_s18 = sshll.u32 %s2031_s0, 4  ;;  %s89_s15 = int_to_ptr.vmem [resolvable:$true] %s88_s15  ;;  %s22_s18 = int_to_ptr.hbm [resolvable:$true] %s21_s18 }
   0xc   :  { %s1498_s19 = smov 64   ;;  %s1499_s20 = smov 4  }
   0xd   :  { %94 = dma.hbm_to_vmem [thread:$0]  %s87_s14, 512, %s89_s15, [#allocation12], %s1498_s19, %s1498_s19, %s1499_s20  }
   0xe   :  { %s1500_s21 = smov [#allocation2]   ;;  %s47_s25 = sshll.u32 %s2033_s2, 4  ;;  %s48_s25 = int_to_ptr.hbm [resolvable:$true] %s47_s25 }
   0xf   :  { %s23_s22 = sshll.u32 %s1500_s21, 4  ;;  %s73_s0 = sshll.u32 %s2035_s4, 4  ;;  %s24_s22 = int_to_ptr.vmem [resolvable:$true] %s23_s22  ;;  %s74_s0 = int_to_ptr.hbm [resolvable:$true] %s73_s0 }
  0x10   :  { %29 = dma.hbm_to_vmem [thread:$0]  %s22_s18, 512, %s24_s22, [#allocation3], %s1494_s9, %s1494_s9, %s1495_s10  }
  0x11   :  { %s1501_s27 = smov [#allocation7]   ;;  %s1502_s29 = smov [#allocation10]  }
  0x12   :  { %s49_s28 = sshll.u32 %s1501_s27, 4  ;;  %s75_s2 = sshll.u32 %s1502_s29, 4  ;;  %s50_s28 = int_to_ptr.vmem [resolvable:$true] %s49_s28  ;;  %s76_s2 = int_to_ptr.vmem [resolvable:$true] %s75_s2 }
  0x13   :  { %55 = dma.hbm_to_vmem [thread:$0]  %s48_s25, 512, %s50_s28, [#allocation6], %s1494_s9, %s1494_s9, %s1495_s10  }
  0x14   :  { %s99_s11 = sshll.u32 %s2037_s6, 4  ;;  %s1503_s12 = smov [#allocation13]   ;;  %s100_s11 = int_to_ptr.hbm [resolvable:$true] %s99_s11 }
  0x15   :  { %81 = dma.hbm_to_vmem [thread:$0]  %s74_s0, 512, %s76_s2, [#allocation9], %s1498_s19, %s1498_s19, %s1499_s20  }
  0x16   :  { %s101_s1 = sshll.u32 %s1503_s12, 4  ;;  %s102_s1 = int_to_ptr.vmem [resolvable:$true] %s101_s1 }
  0x17   :  { %107 = dma.hbm_to_vmem [thread:$0]  %s100_s11, 2048, %s102_s1, [#allocation12], %s1498_s19, %s1498_s19, %s1499_s20  }
  0x18   :  { %1423 = dma.done.wait [#allocation3], 512  }
  0x19   :  { %1424 = vsyncadd [#allocation3], 4294966784 }
  0x1a   :  { %1425 = dma.done.wait [#allocation6], 1024  }
  0x1b   :  { %1426 = vsyncadd [#allocation6], 4294966272 }
  0x1c   :  { %1427 = dma.done.wait [#allocation9], 2560  }
  0x1d   :  { %1428 = vsyncadd [#allocation9], 4294964736 }
  0x1e   :  { %1429 = dma.done.wait [#allocation12], 2560  }
  0x1f   :  { %1430 = vsyncadd [#allocation12], 4294964736  ;;  %v1578_v0 = vld [vmem:[#allocation2] sm:$0xff]  ;;  %v1580_v1 = vld [vmem:[#allocation2 + $0x8] sm:$0xff]  ;;  %s1786_s6 = smov 0  }
  0x20   :  { %2045 = vst [vmem:[#allocation20_spill] sm:$0xff] %v1578_v0  ;;  %v1582_v2 = vld [vmem:[#allocation2 + $0x10] sm:$0xff]  ;;  %v1584_v3 = vld [vmem:[#allocation2 + $0x18] sm:$0xff]  ;;  %v1586_v4 = vld [vmem:[#allocation5] sm:$0xff]  }
  0x21   :  { %2046 = vst [vmem:[#allocation21_spill] sm:$0xff] %v1580_v1  ;;  %v1588_v5 = vld [vmem:[#allocation5 + $0x8] sm:$0xff]   ;;  %v1590_v6 = vld [vmem:[#allocation5 + $0x10] sm:$0xff]   ;;  %v1592_v7 = vld [vmem:[#allocation5 + $0x18] sm:$0xff]  }
  0x22   :  { %2047 = vst [vmem:[#allocation22_spill] sm:$0xff] %v1582_v2  ;;  %v1594_v8 = vld [vmem:[#allocation8 + $0x4] sm:$0xf]  ;;  %v1596_v9 = vld [vmem:[#allocation8] sm:$0xf]  ;;  %v1754_v2 = vmov 1.0  }
  0x23   :  { %2048 = vst [vmem:[#allocation23_spill] sm:$0xff] %v1584_v3  ;;  %v1598_v10 = vld [vmem:[#allocation8 + $0x8] sm:$0xf0]  ;;  %v1600_v11 = vld [vmem:[#allocation8 + $0x4] sm:$0xf0] }
  0x24   :  { %2049 = vst [vmem:[#allocation24_spill] sm:$0xff] %v1594_v8  ;;  %v1602_v12 = vld [vmem:[#allocation8 + $0x14] sm:$0xf]  ;;  %v1604_v13 = vld [vmem:[#allocation8 + $0x10] sm:$0xf] }
  0x25   :  { %2050 = vst [vmem:[#allocation25_spill] sm:$0xff] %v1596_v9  ;;  %v1606_v14 = vld [vmem:[#allocation8 + $0x18] sm:$0xf0]  ;;  %v1608_v15 = vld [vmem:[#allocation8 + $0x14] sm:$0xf0] }
  0x26   :  { %2051 = vst [vmem:[#allocation26_spill] sm:$0xff] %v1598_v10  ;;  %v1610_v16 = vld [vmem:[#allocation8 + $0x24] sm:$0xf]  ;;  %v1612_v17 = vld [vmem:[#allocation8 + $0x20] sm:$0xf] }
  0x27   :  { %2052 = vst [vmem:[#allocation27_spill] sm:$0xff] %v1600_v11  ;;  %v1614_v18 = vld [vmem:[#allocation8 + $0x28] sm:$0xf0]  ;;  %v1616_v19 = vld [vmem:[#allocation8 + $0x24] sm:$0xf0] }
  0x28   :  { %2053 = vst [vmem:[#allocation28_spill] sm:$0xff] %v1602_v12  ;;  %v1618_v20 = vld [vmem:[#allocation8 + $0x34] sm:$0xf]  ;;  %v1620_v21 = vld [vmem:[#allocation8 + $0x30] sm:$0xf] }
  0x29   :  { %2054 = vst [vmem:[#allocation29_spill] sm:$0xff] %v1604_v13  ;;  %v1622_v22 = vld [vmem:[#allocation8 + $0x38] sm:$0xf0]  ;;  %v1624_v23 = vld [vmem:[#allocation8 + $0x34] sm:$0xf0] }
  0x2a   :  { %2055 = vst [vmem:[#allocation30_spill] sm:$0xff] %v1606_v14  ;;  %v1626_v24 = vld [vmem:[#allocation8 + $0x44] sm:$0xf]  ;;  %v1628_v25 = vld [vmem:[#allocation8 + $0x40] sm:$0xf] }
  0x2b   :  { %2056 = vst [vmem:[#allocation31_spill] sm:$0xff] %v1608_v15  ;;  %v1630_v26 = vld [vmem:[#allocation8 + $0x48] sm:$0xf0]  ;;  %v1632_v27 = vld [vmem:[#allocation8 + $0x44] sm:$0xf0] }
  0x2c   :  { %2057 = vst [vmem:[#allocation32_spill] sm:$0xff] %v1610_v16  ;;  %v1634_v28 = vld [vmem:[#allocation8 + $0x54] sm:$0xf]  ;;  %v1636_v29 = vld [vmem:[#allocation8 + $0x50] sm:$0xf] }
  0x2d   :  { %2058 = vst [vmem:[#allocation33_spill] sm:$0xff] %v1612_v17  ;;  %v1638_v30 = vld [vmem:[#allocation8 + $0x58] sm:$0xf0]  ;;  %v1640_v31 = vld [vmem:[#allocation8 + $0x54] sm:$0xf0] }
  0x2e   :  { %2059 = vst [vmem:[#allocation34_spill] sm:$0xff] %v1614_v18  ;;  %v1642_v32 = vld [vmem:[#allocation8 + $0x64] sm:$0xf]  ;;  %v1644_v33 = vld [vmem:[#allocation8 + $0x60] sm:$0xf] }
  0x2f   :  { %2060 = vst [vmem:[#allocation35_spill] sm:$0xff] %v1616_v19  ;;  %v1646_v34 = vld [vmem:[#allocation8 + $0x68] sm:$0xf0]  ;;  %v1648_v35 = vld [vmem:[#allocation8 + $0x64] sm:$0xf0] }
  0x30   :  { %2061 = vst [vmem:[#allocation36_spill] sm:$0xff] %v1618_v20  ;;  %v1650_v36 = vld [vmem:[#allocation8 + $0x74] sm:$0xf]  ;;  %v1652_v37 = vld [vmem:[#allocation8 + $0x70] sm:$0xf] }
  0x31   :  { %2062 = vst [vmem:[#allocation37_spill] sm:$0xff] %v1620_v21  ;;  %v1654_v38 = vld [vmem:[#allocation8 + $0x78] sm:$0xf0]  ;;  %v1656_v39 = vld [vmem:[#allocation8 + $0x74] sm:$0xf0] }
  0x32   :  { %2063 = vst [vmem:[#allocation38_spill] sm:$0xff] %v1622_v22  ;;  %v1658_v40 = vld [vmem:[#allocation10] sm:$0xf]  ;;  %v1660_v41 = vld [vmem:[#allocation10] sm:$0xf0] }
  0x33   :  { %v1662_v42 = vld [vmem:[#allocation10 + $0x8] sm:$0xf]  ;;  %v1664_v43 = vld [vmem:[#allocation10 + $0x8] sm:$0xf0]  ;;  %v1666_v44 = vld [vmem:[#allocation10 + $0x10] sm:$0xf] }
  0x34   :  { %v1668_v45 = vld [vmem:[#allocation10 + $0x10] sm:$0xf0]  ;;  %v1670_v46 = vld [vmem:[#allocation10 + $0x18] sm:$0xf]  ;;  %v1672_v47 = vld [vmem:[#allocation10 + $0x18] sm:$0xf0] }
  0x35   :  { %2064 = vst [vmem:[#allocation39_spill] sm:$0xff] %v1672_v47  ;;  %v1674_v48 = vld [vmem:[#allocation11] sm:$0xf]  ;;  %v1676_v49 = vld [vmem:[#allocation11] sm:$0xf0]  ;;  %v1758_v47 = vmov 0.0  }
  0x36   :  { %2065 = vst [vmem:[#allocation40_spill] sm:$0xff] %v1674_v48  ;;  %v1678_v50 = vld [vmem:[#allocation11 + $0x8] sm:$0xf]  ;;  %v1680_v51 = vld [vmem:[#allocation11 + $0x8] sm:$0xf0] }
  0x37   :  { %2066 = vst [vmem:[#allocation41_spill] sm:$0xff] %v1676_v49  ;;  %v1682_v52 = vld [vmem:[#allocation11 + $0x10] sm:$0xf]  ;;  %v1684_v53 = vld [vmem:[#allocation11 + $0x10] sm:$0xf0] }
  0x38   :  { %2067 = vst [vmem:[#allocation42_spill] sm:$0xff] %v1678_v50  ;;  %v1686_v54 = vld [vmem:[#allocation11 + $0x18] sm:$0xf]  ;;  %v1688_v55 = vld [vmem:[#allocation11 + $0x18] sm:$0xf0] }
  0x39   :  { %2068 = vst [vmem:[#allocation43_spill] sm:$0xff] %v1680_v51  ;;  %v1690_v56 = vld [vmem:[#allocation13] sm:$0xf]  ;;  %v1692_v57 = vld [vmem:[#allocation13] sm:$0xf0] }
  0x3a   :  { %2069 = vst [vmem:[#allocation44_spill] sm:$0xff] %v1682_v52  ;;  %v1694_v58 = vld [vmem:[#allocation13 + $0x8] sm:$0xf]  ;;  %v1696_v59 = vld [vmem:[#allocation13 + $0x8] sm:$0xf0] }
  0x3b   :  { %2070 = vst [vmem:[#allocation45_spill] sm:$0xff] %v1684_v53  ;;  %v1698_v60 = vld [vmem:[#allocation13 + $0x10] sm:$0xf]  ;;  %v1700_v61 = vld [vmem:[#allocation13 + $0x10] sm:$0xf0] }
  0x3c   :  { %2071 = vst [vmem:[#allocation46_spill] sm:$0xff] %v1686_v54  ;;  %v1702_v62 = vld [vmem:[#allocation13 + $0x18] sm:$0xf]  ;;  %v1704_v63 = vld [vmem:[#allocation13 + $0x18] sm:$0xf0] }
  0x3d   :  { %2072 = vst [vmem:[#allocation47_spill] sm:$0xff] %v1688_v55  ;;  %v1706_v53 = vld [vmem:[#allocation13 + $0x20] sm:$0xf]  ;;  %v1708_v54 = vld [vmem:[#allocation13 + $0x20] sm:$0xf0] }
  0x3e   :  { %2073 = vst [vmem:[#allocation48_spill] sm:$0xff] %v1690_v56  ;;  %v1710_v55 = vld [vmem:[#allocation13 + $0x28] sm:$0xf]  ;;  %v1712_v56 = vld [vmem:[#allocation13 + $0x28] sm:$0xf0] }
  0x3f   :  { %2074 = vst [vmem:[#allocation49_spill] sm:$0xff] %v1692_v57  ;;  %v1714_v57 = vld [vmem:[#allocation13 + $0x30] sm:$0xf]  ;;  %v1728_v52 = vld [vmem:[#allocation13 + $0x48] sm:$0xf0] }
  0x40   :  { %2075 = vst [vmem:[#allocation50_spill] sm:$0xff] %v1694_v58  ;;  %v1716_v58 = vld [vmem:[#allocation13 + $0x30] sm:$0xf0] }
  0x41   :  { %2076 = vst [vmem:[#allocation51_spill] sm:$0xff] %v1696_v59  ;;  %v1718_v59 = vld [vmem:[#allocation13 + $0x38] sm:$0xf] }
  0x42   :  { %2077 = vst [vmem:[#allocation52_spill] sm:$0xff] %v1698_v60  ;;  %v1720_v60 = vld [vmem:[#allocation13 + $0x38] sm:$0xf0] }
  0x43   :  { %2078 = vst [vmem:[#allocation53_spill] sm:$0xff] %v1700_v61  ;;  %v1722_v61 = vld [vmem:[#allocation13 + $0x40] sm:$0xf] }
  0x44   :  { %2079 = vst [vmem:[#allocation54_spill] sm:$0xff] %v1702_v62  ;;  %v1724_v62 = vld [vmem:[#allocation13 + $0x40] sm:$0xf0] }
  0x45   :  { %2080 = vst [vmem:[#allocation55_spill] sm:$0xff] %v1704_v63  ;;  %v1726_v63 = vld [vmem:[#allocation13 + $0x48] sm:$0xf] }
  0x46   :  { %2081 = vst [vmem:[#allocation56_spill] sm:$0xff] %v1706_v53  ;;  %v1732_v53 = vld [vmem:[#allocation13 + $0x50] sm:$0xf0] }
  0x47   :  { %2082 = vst [vmem:[#allocation57_spill] sm:$0xff] %v1708_v54  ;;  %v1730_v54 = vld [vmem:[#allocation13 + $0x50] sm:$0xf] }
  0x48   :  { %2083 = vst [vmem:[#allocation58_spill] sm:$0xff] %v1710_v55  ;;  %v1736_v55 = vld [vmem:[#allocation13 + $0x58] sm:$0xf0] }
  0x49   :  { %2084 = vst [vmem:[#allocation59_spill] sm:$0xff] %v1712_v56  ;;  %v1734_v56 = vld [vmem:[#allocation13 + $0x58] sm:$0xf] }
  0x4a   :  { %2085 = vst [vmem:[#allocation60_spill] sm:$0xff] %v1714_v57  ;;  %v1740_v57 = vld [vmem:[#allocation13 + $0x60] sm:$0xf0] }
  0x4b   :  { %2086 = vst [vmem:[#allocation61_spill] sm:$0xff] %v1716_v58  ;;  %v1738_v58 = vld [vmem:[#allocation13 + $0x60] sm:$0xf] }
  0x4c   :  { %2087 = vst [vmem:[#allocation62_spill] sm:$0xff] %v1718_v59  ;;  %v147_v59 = vld [vmem:[#allocation7 + $0x10] sm:$0xff]  }
  0x4d   :  { %2088 = vst [vmem:[#allocation63_spill] sm:$0xff] %v1720_v60  ;;  %v1742_v60 = vld [vmem:[#allocation13 + $0x68] sm:$0xf]  ;;  %v215_v50 = vmul.f32 %v147_v59, %v147_v59 }
  0x4e   :  { %2089 = vst [vmem:[#allocation64_spill] sm:$0xff] %v1722_v61  ;;  %v1744_v61 = vld [vmem:[#allocation13 + $0x68] sm:$0xf0] }
  0x4f   :  { %2090 = vst [vmem:[#allocation65_spill] sm:$0xff] %v1724_v62  ;;  %v1746_v62 = vld [vmem:[#allocation13 + $0x70] sm:$0xf] }
  0x50   :  { %2091 = vst [vmem:[#allocation66_spill] sm:$0xff] %v1726_v63  ;;  %v1748_v63 = vld [vmem:[#allocation13 + $0x70] sm:$0xf0] }
  0x51   :  { %2092 = vst [vmem:[#allocation67_spill] sm:$0xff] %v1728_v52  ;;  %v1750_v52 = vld [vmem:[#allocation13 + $0x78] sm:$0xf] }
  0x52   :  { %2093 = vst [vmem:[#allocation68_spill] sm:$0xff] %v1730_v54  ;;  %v1752_v54 = vld [vmem:[#allocation13 + $0x78] sm:$0xf0] }
  0x53   :  { %2094 = vst [vmem:[#allocation69_spill] sm:$0xff] %v1732_v53  ;;  %v145_v53 = vld [vmem:[#allocation7] sm:$0xff]  }
  0x54   :  { %2095 = vst [vmem:[#allocation70_spill] sm:$0xff] %v1734_v56  ;;  %v146_v56 = vld [vmem:[#allocation7 + $0x8] sm:$0xff]   ;;  %v213_v51 = vmul.f32 %v145_v53, %v145_v53 }
  0x55   :  { %2096 = vst [vmem:[#allocation71_spill] sm:$0xff] %v1736_v55  ;;  %v148_v55 = vld [vmem:[#allocation7 + $0x18] sm:$0xff]  }
  0x56   :  { %2097 = vst [vmem:[#allocation72_spill] sm:$0xff] %v1738_v58  ;;  %v214_v58 = vmul.f32 %v146_v56, %v146_v56 }
  0x57   :  { %2098 = vst [vmem:[#allocation73_spill] sm:$0xff] %v1740_v57  ;;  %v216_v57 = vmul.f32 %v148_v55, %v148_v55 }
  0x58   :  { %2099 = vst [vmem:[#allocation74_spill] sm:$0xff] %v1742_v60  ;;  %v217_v49 = vadd.f32 %v214_v58, %v213_v51  ;;  %v1760_v51 = vmov 0.0  }
  0x59   :  { %2100 = vst [vmem:[#allocation75_spill] sm:$0xff] %v1744_v61 }
  0x5a   :  { %2101 = vst [vmem:[#allocation76_spill] sm:$0xff] %v1746_v62  ;;  %v218_v60 = vadd.f32 %v217_v49, %v215_v50  ;;  %v1762_v49 = vmov 0.0  }
  0x5b   :  { %2102 = vst [vmem:[#allocation77_spill] sm:$0xff] %v1748_v63 }
  0x5c   :  { %2103 = vst [vmem:[#allocation78_spill] sm:$0xff] %v1750_v52  ;;  %v219_v48 = vadd.f32 %v218_v60, %v216_v57 }
  0x5d   :  { %2104 = vst [vmem:[#allocation79_spill] sm:$0xff] %v1752_v54 }
  0x5e   :  { %220 = vadd.xlane.f32.xlu0 %v219_v48  ;;  %v1764_v48 = vmov 0.0  }
  0xd1   :  { %v221_v61 = vpop.xlane.xlu0 %220 }
  0xd2   :  { %v222_v62 = vrot.slane %v221_v61, 4 }
  0xd4   :  { %v223_v0 = vadd.f32 %v222_v62, %v221_v61 }
  0xd6   :  { %v224_v63 = vrot.slane %v223_v0, 2 }
  0xd8   :  { %v225_v1 = vadd.f32 %v224_v63, %v223_v0 }
  0xda   :  { %v226_v52 = vrot.slane %v225_v1, 1 }
  0xdc   :  { %v227_v3 = vadd.f32 %v226_v52, %v225_v1 }
  0xde   :  { %1029 = vpush %v227_v3 }
 0x10f   :  { %s1030_s4 = spop %1029 }
 0x110   :  { %v229_v54 = vstv %s1030_s4  }
 0x111 LB: > { %v880_v0 = vor.u32 %v1656_v39, %v1652_v37  ;;  %v884_v1 = vor.u32 %v1650_v36, %v1654_v38  ;;  %v872_v3 = vor.u32 %v1648_v35, %v1644_v33  ;;  %v876_v50 = vor.u32 %v1642_v32, %v1646_v34  ;;  %p251_p0 = scmp.gt.s32.totalorder %s1491_s6, 1  ;;  %v2105_v21 = vld [vmem:[#allocation37_spill] sm:$0xff]  ;;  %v2106_v22 = vld [vmem:[#allocation38_spill] sm:$0xff]  ;;  %v2107_v20 = vld [vmem:[#allocation36_spill] sm:$0xff]  ;;  %s235_s6 = sadd.s32 1, %s1491_s6   ;;  %s1491_s6 = sphi %s1786_s6, %s235_s6   ;;  %v1487_v4 = vphi %v1586_v4, %v2169_v4   ;;  %v1483_v5 = vphi %v1588_v5, %v2168_v5   ;;  %v1479_v6 = vphi %v1590_v6, %v2167_v6   ;;  %v1475_v7 = vphi %v1592_v7, %v2166_v7   ;;  %v1471_v53 = vphi %v145_v53, %v725_v53   ;;  %v1467_v56 = vphi %v146_v56, %v726_v56   ;;  %v1463_v59 = vphi %v147_v59, %v727_v59   ;;  %v1459_v55 = vphi %v148_v55, %v728_v55   ;;  %v1455_v48 = vphi %v1764_v48, %v1872_v48   ;;  %v1451_v49 = vphi %v1762_v49, %v1875_v49   ;;  %v1447_v51 = vphi %v1760_v51, %v1882_v51   ;;  %v1443_v47 = vphi %v1758_v47, %v1885_v47   ;;  %v1439_v54 = vphi %v229_v54, %v747_v54   ;;  %v1435_v2 = vphi %v1754_v2, %v746_v2  }
 0x112   : > { %v864_v52 = vor.u32 %v1640_v31, %v1636_v29  ;;  %v868_v57 = vor.u32 %v1634_v28, %v1638_v30  ;;  %1167 = vrcp.f32 %v1435_v2  ;;  %v856_v58 = vor.u32 %v1632_v27, %v1628_v25  ;;  %v2108_v17 = vld [vmem:[#allocation33_spill] sm:$0xff]  ;;  %v2109_v19 = vld [vmem:[#allocation35_spill] sm:$0xff]  ;;  %v2110_v18 = vld [vmem:[#allocation34_spill] sm:$0xff]  ;;  %p1985_p1 = scmp.ge.s32.totalorder %s235_s6, 50  }
 0x113   : > { %361 = vmatpush.bf16.msra.mxu0 %v880_v0  ;;  %380 = vmatpush.bf16.msra.mxu1 %v884_v1  ;;  %v860_v60 = vor.u32 %v1626_v24, %v1630_v26  ;;  %v848_v62 = vor.u32 %v1624_v23, %v2105_v21  ;;  %v852_v63 = vor.u32 %v2107_v20, %v2106_v22  ;;  %v263_v1 = vand.u32 2147483648, %v1435_v2  ;;  %s267_s13 = scalar_select %p251_p0, 1, 0  ;;  %v2111_v16 = vld [vmem:[#allocation32_spill] sm:$0xff]  ;;  %v2112_v13 = vld [vmem:[#allocation29_spill] sm:$0xff]  ;;  %v2113_v15 = vld [vmem:[#allocation31_spill] sm:$0xff] }
 0x114   : > { %vm257_vm0 = vweird.f32 %v1435_v2  ;;  %v832_v21 = vor.u32 %v2113_v15, %v2112_v13  ;;  %v2114_v14 = vld [vmem:[#allocation30_spill] sm:$0xff]  ;;  %v2115_v12 = vld [vmem:[#allocation28_spill] sm:$0xff]  ;;  %v2116_v9 = vld [vmem:[#allocation25_spill] sm:$0xff]  ;;  %vm423_vm5 = vcmask 523264   ;;  %vm250_vm6 = vcmp.ge.f32.partialorder %v1439_v54, 1e-15 }
 0x115   : > { %v2117_v11 = vld [vmem:[#allocation27_spill] sm:$0xff]  ;;  %v2118_v10 = vld [vmem:[#allocation26_spill] sm:$0xff]  ;;  %v2119_v8 = vld [vmem:[#allocation24_spill] sm:$0xff]  ;;  %s758_s18 = sshll.u32 (%p1985_p1), %s2038_s7, 4  ;;  %s1504_s19 = smov (%p1985_p1), [#allocation14]   ;;  %s759_s18 = int_to_ptr.hbm [resolvable:$true] %s758_s18 }
 0x116   :  { %s756_s20 = sshll.u32 (%p1985_p1), %s1504_s19, 4  ;;  %s757_s20 = int_to_ptr.vmem [resolvable:$true] %s756_s20 }
 0x117   : > { %362 = vmatpush.bf16.msra.mxu0 %v872_v3  ;;  %381 = vmatpush.bf16.msra.mxu1 %v876_v50  ;;  %v261_v50 = vand.u32 2147483647, %v1435_v2 }
 0x118   : > { %v1168_v61 = vpop.eup %1167 }
 0x119   : > { %v253_v0 = vmul.f32 %v1435_v2, %v1168_v61  ;;  %vm258_vm1 = vweird.f32 %v1168_v61  ;;  %vm262_vm3 = vcmp.eq.f32.partialorder %v261_v50, 8.507059e+37  ;;  %v746_v2 = vsel %vm250_vm6, %v1439_v54, %v1435_v2  }
 0x11a   : > { %vm259_vm2 = vmor %vm257_vm0, %vm258_vm1 }
 0x11b   : > { %363 = vmatpush.bf16.msra.mxu0 %v864_v52  ;;  %382 = vmatpush.bf16.msra.mxu1 %v868_v57  ;;  %v254_v3 = vsub.f32 1.0, %v253_v0  ;;  %v840_v52 = vor.u32 %v2109_v19, %v2108_v17  ;;  %v844_v57 = vor.u32 %v2111_v16, %v2110_v18  ;;  %v268_v0 = vstv %s267_s13  ;;  %v2126_v16 = vld [vmem:[#allocation41_spill] sm:$0xff] }
 0x11c   : > { %vm269_vm4 = vcmp.eq.s32.totalorder %v268_v0, 1 }
 0x11f   : > { %364 = vmatpush.bf16.msra.mxu0 %v856_v58  ;;  %383 = vmatpush.bf16.msra.mxu1 %v860_v60  ;;  %v255_v58 = vmul.f32 %v1168_v61, %v254_v3  ;;  %v264_v60 = vor.u32 1.1754944e-38, %v263_v1  ;;  %v824_v3 = vor.u32 %v2117_v11, %v2116_v9  ;;  %v828_v1 = vor.u32 %v2119_v8, %v2118_v10  ;;  %v2123_v8 = vld [vmem:[#allocation21_spill] sm:$0xff]  ;;  %v2124_v10 = vld [vmem:[#allocation20_spill] sm:$0xff] }
 0x121   : > { %v256_v20 = vadd.f32 %v1168_v61, %v255_v58 }
 0x123   : > { %365 = vmatpush.bf16.msra.mxu0 %v848_v62  ;;  %384 = vmatpush.bf16.msra.mxu1 %v852_v63  ;;  %v836_v62 = vor.u32 %v2115_v12, %v2114_v14  ;;  %v260_v63 = vsel %vm259_vm2, %v1168_v61, %v256_v20 }
 0x124   : > { %v265_v22 = vsel %vm262_vm3, %v264_v60, %v260_v63 }
 0x125   : > { %v266_v17 = vmul.f32 %v1439_v54, %v265_v22 }
 0x127   : > { %366 = vmatpush.bf16.msra.mxu0 %v840_v52  ;;  %385 = vmatpush.bf16.msra.mxu1 %v844_v57  ;;  %v270_v50 = vsel %vm269_vm4, %v266_v17, 0.0 }
 0x128   : > { %v271_v52 = vmul.f32 %v1455_v48, %v270_v50  ;;  %v272_v57 = vmul.f32 %v1451_v49, %v270_v50  ;;  %v274_v17 = vmul.f32 %v1443_v47, %v270_v50 }
 0x12a   : > { %v1872_v48 = vadd.f32 %v1471_v53, %v271_v52   ;;  %v1875_v49 = vadd.f32 %v1467_v56, %v272_v57   ;;  %v1885_v47 = vadd.f32 %v1459_v55, %v274_v17   ;;  %v892_v17 = vor.u32 %v1664_v43, %v1662_v42 }
 0x12b   : > { %367 = vmatpush.bf16.msra.mxu0 %v832_v21  ;;  %386 = vmatpush.bf16.msra.mxu1 %v836_v62  ;;  %v273_v21 = vmul.f32 %v1447_v51, %v270_v50 }
 0x12c   : > { %v279_v20 = vpack.c.bf16 %v1875_v49, %v1872_v48 }
 0x12d   : > { %v1882_v51 = vadd.f32 %v1463_v59, %v273_v21   ;;  %v888_v21 = vor.u32 %v1660_v41, %v1658_v40 }
 0x12f   : > { %368 = vmatpush.bf16.msra.mxu0 %v824_v3  ;;  %387 = vmatpush.bf16.msra.mxu1 %v828_v1  ;;  %v280_v22 = vpack.c.bf16 %v1885_v47, %v1882_v51 }
 0x132   : > { %369 = vmatmul.bf16.vlgmr.msra.gmra.mxu0 %v279_v20  ;;  %388 = vmatmul.bf16.vlgmr.msra.gmra.mxu1 %v279_v20 }
 0x142   : > { %374 = vmatmul.bf16.gmra.mxu0 %v280_v22  ;;  %393 = vmatmul.bf16.gmra.mxu1 %v280_v22  ;;  %v896_v22 = vor.u32 %v1668_v45, %v1666_v44 }
 0x1af   : > { %v370_v61 = vpop.f32.mrf.mxu0  ;;  %v389_v58 = vpop.f32.mrf.mxu1 }
 0x1b7   : > { %v391_v60 = vpop.f32.mrf.mxu1  ;;  %v372_v0 = vpop.f32.mrf.mxu0 }
 0x1b8   : > { %v401_v50 = vpack.c.bf16 %v391_v60, %v389_v58  ;;  %v399_v20 = vpack.c.bf16 %v372_v0, %v370_v61  ;;  %v2120_v58 = vld [vmem:[#allocation39_spill] sm:$0xff] }
 0x1b9   : > { %v900_v61 = vor.u32 %v2120_v58, %v1670_v46 }
 0x1bf   : > { %v394_v62 = vpop.f32.mrf.mxu1  ;;  %v375_v63 = vpop.f32.mrf.mxu0 }
 0x1c7   : > { %v396_v3 = vpop.f32.mrf.mxu1  ;;  %v377_v52 = vpop.f32.mrf.mxu0 }
 0x1c8   : > { %v402_v1 = vpack.c.bf16 %v396_v3, %v394_v62  ;;  %v400_v57 = vpack.c.bf16 %v377_v52, %v375_v63 }
 0x1ca   : > { %440 = vmatpush.bf16.msra.mxu2 %v402_v1 }
 0x1ce   : > { %441 = vmatpush.bf16.msra.mxu2 %v401_v50 }
 0x1d2   : > { %442 = vmatpush.bf16.msra.mxu2 %v400_v57  ;;  %v2121_v57 = vld [vmem:[#allocation22_spill] sm:$0xff] }
 0x1d6   : > { %443 = vmatpush.bf16.msra.mxu2 %v399_v20 }
 0x1d9   : > { %901 = vmatmul.msk.bf16.vlgmr.msra.gmra.mxu2 %vm423_vm5, %v888_v21  ;;  %v2122_v21 = vld [vmem:[#allocation23_spill] sm:$0xff] }
 0x1e9   : > { %902 = vmatmul.msk.bf16.gmra.mxu2 %vm423_vm5, %v892_v17 }
 0x1f9   : > { %903 = vmatmul.msk.bf16.gmra.mxu2 %vm423_vm5, %v896_v22 }
 0x209   : > { %904 = vmatmul.msk.bf16.gmra.mxu2 %vm423_vm5, %v900_v61 }
 0x25c   : > { %v445_v60 = vpop.f32.mrf.mxu2 }
 0x25d   : > { %v465_v15 = vmul.f32 %v445_v60, %v2124_v10 }
 0x264   : > { %v447_v0 = vpop.f32.mrf.mxu2 }
 0x265   : > { %v466_v13 = vmul.f32 %v447_v0, %v2123_v8  ;;  %v2132_v0 = vld [vmem:[#allocation61_spill] sm:$0xff] }
 0x26c   : > { %v450_v62 = vpop.f32.mrf.mxu2 }
 0x26d   : > { %v467_v12 = vmul.f32 %v450_v62, %v2121_v57 }
 0x274   : > { %v452_v63 = vpop.f32.mrf.mxu2 }
 0x275   : > { %v468_v58 = vmul.f32 %v452_v63, %v2122_v21 }
 0x277   : > { %v474_v14 = vpack.c.bf16 %v468_v58, %v467_v12  ;;  %v2131_v12 = vld [vmem:[#allocation60_spill] sm:$0xff] }
 0x278   : > { %v952_v60 = vor.u32 %v2132_v0, %v2131_v12  ;;  %v2137_v58 = vld [vmem:[#allocation44_spill] sm:$0xff]  ;;  %v2145_v0 = vld [vmem:[#allocation50_spill] sm:$0xff] }
 0x27c   : > { %v455_v3 = vpop.f32.mrf.mxu2 }
 0x27d   : > { %v469_v11 = vmul.f32 %v455_v3, %v2124_v10  ;;  %v2127_v3 = vld [vmem:[#allocation42_spill] sm:$0xff] }
 0x284   : > { %v457_v1 = vpop.f32.mrf.mxu2 }
 0x285   : > { %v470_v9 = vmul.f32 %v457_v1, %v2123_v8 }
 0x287   : > { %v475_v61 = vpack.c.bf16 %v470_v9, %v469_v11  ;;  %v2129_v9 = vld [vmem:[#allocation62_spill] sm:$0xff]  ;;  %v2130_v11 = vld [vmem:[#allocation63_spill] sm:$0xff] }
 0x288   : > { %v956_v62 = vor.u32 %v2130_v11, %v2129_v9  ;;  %v2143_v11 = vld [vmem:[#allocation52_spill] sm:$0xff] }
 0x28a   : > { %642 = vmatpush.bf16.msrb.mxu0 %v956_v62  ;;  %v2144_v62 = vld [vmem:[#allocation53_spill] sm:$0xff] }
 0x28b   : > { %v936_v12 = vor.u32 %v2144_v62, %v2143_v11  ;;  %v2157_v62 = vld [vmem:[#allocation70_spill] sm:$0xff] }
 0x28c   : > { %v460_v50 = vpop.f32.mrf.mxu2 }
 0x28d   : > { %v471_v20 = vmul.f32 %v460_v50, %v2121_v57  ;;  %v473_v50 = vpack.c.bf16 %v466_v13, %v465_v15  ;;  %v2133_v13 = vld [vmem:[#allocation58_spill] sm:$0xff] }
 0x28e   : > { %643 = vmatpush.bf16.msrb.mxu0 %v952_v60  ;;  %v2146_v60 = vld [vmem:[#allocation51_spill] sm:$0xff] }
 0x294   : > { %v462_v52 = vpop.f32.mrf.mxu2 }
 0x295   : > { %v472_v17 = vmul.f32 %v462_v52, %v2122_v21  ;;  %v2125_v52 = vld [vmem:[#allocation40_spill] sm:$0xff] }
 0x296   : > { %v908_v1 = vor.u32 %v2126_v16, %v2125_v52  ;;  %v2135_v16 = vld [vmem:[#allocation56_spill] sm:$0xff]  ;;  %v2139_v52 = vld [vmem:[#allocation54_spill] sm:$0xff] }
 0x297   : > { %v476_v22 = vpack.c.bf16 %v472_v17, %v471_v20  ;;  %v2128_v20 = vld [vmem:[#allocation43_spill] sm:$0xff]  ;;  %v2136_v17 = vld [vmem:[#allocation57_spill] sm:$0xff] }
 0x298   : > { %v912_v63 = vor.u32 %v2128_v20, %v2127_v3  ;;  %v2141_v20 = vld [vmem:[#allocation46_spill] sm:$0xff] }
 0x299   : > { %513 = vmatpush.bf16.msra.mxu3 %v476_v22  ;;  %v944_v22 = vor.u32 %v2136_v17, %v2135_v16  ;;  %v2149_v17 = vld [vmem:[#allocation78_spill] sm:$0xff] }
 0x29d   : > { %514 = vmatpush.bf16.msra.mxu3 %v475_v61  ;;  %v2138_v61 = vld [vmem:[#allocation45_spill] sm:$0xff] }
 0x2a1   : > { %515 = vmatpush.bf16.msra.mxu3 %v474_v14  ;;  %v2134_v14 = vld [vmem:[#allocation59_spill] sm:$0xff] }
 0x2a2   : > { %v948_v15 = vor.u32 %v2134_v14, %v2133_v13  ;;  %v932_v13 = vor.u32 %v2146_v60, %v2145_v0  ;;  %v2147_v14 = vld [vmem:[#allocation48_spill] sm:$0xff] }
 0x2a3   : > { %v2159_v60 = vld [vmem:[#allocation68_spill] sm:$0xff] }
 0x2a4   : > { %644 = vmatpush.bf16.msrb.mxu0 %v948_v15  ;;  %v2148_v15 = vld [vmem:[#allocation49_spill] sm:$0xff] }
 0x2a5   : > { %516 = vmatpush.bf16.msra.mxu3 %v473_v50  ;;  %v916_v50 = vor.u32 %v2138_v61, %v2137_v58  ;;  %v928_v16 = vor.u32 %v2148_v15, %v2147_v14  ;;  %v2151_v61 = vld [vmem:[#allocation76_spill] sm:$0xff] }
 0x2a8   : > { %921 = vmatmul.msk.bf16.vlgmr.msra.gmra.mxu3 %vm423_vm5, %v908_v1  ;;  %645 = vmatpush.bf16.msrb.mxu0 %v944_v22  ;;  %v2140_v1 = vld [vmem:[#allocation55_spill] sm:$0xff] }
 0x2a9   : > { %v940_v3 = vor.u32 %v2140_v1, %v2139_v52  ;;  %v2150_v22 = vld [vmem:[#allocation79_spill] sm:$0xff]  ;;  %v2153_v1 = vld [vmem:[#allocation74_spill] sm:$0xff] }
 0x2aa   : > { %v988_v58 = vor.u32 %v2150_v22, %v2149_v17  ;;  %v2162_v17 = vld [vmem:[#allocation67_spill] sm:$0xff] }
 0x2ac   : > { %646 = vmatpush.bf16.msrb.mxu0 %v940_v3  ;;  %661 = vmatpush.bf16.msrb.mxu1 %v988_v58  ;;  %v2154_v3 = vld [vmem:[#allocation75_spill] sm:$0xff]  ;;  %v2163_v58 = vld [vmem:[#allocation64_spill] sm:$0xff] }
 0x2b0   : > { %647 = vmatpush.bf16.msrb.mxu0 %v936_v12  ;;  %v2158_v12 = vld [vmem:[#allocation71_spill] sm:$0xff] }
 0x2b1   : > { %v972_v0 = vor.u32 %v2158_v12, %v2157_v62 }
 0x2b4   : > { %648 = vmatpush.bf16.msrb.mxu0 %v932_v13  ;;  %v2160_v13 = vld [vmem:[#allocation69_spill] sm:$0xff] }
 0x2b5   : > { %v968_v14 = vor.u32 %v2160_v13, %v2159_v60 }
 0x2b8   : > { %922 = vmatmul.msk.bf16.gmra.mxu3 %vm423_vm5, %v912_v63  ;;  %v2142_v63 = vld [vmem:[#allocation47_spill] sm:$0xff]  ;;  %649 = vmatpush.bf16.msrb.mxu0 %v928_v16  ;;  %v2161_v16 = vld [vmem:[#allocation66_spill] sm:$0xff] }
 0x2b9   : > { %v920_v9 = vor.u32 %v2142_v63, %v2141_v20  ;;  %v980_v20 = vor.u32 %v2154_v3, %v2153_v1  ;;  %v2155_v63 = vld [vmem:[#allocation72_spill] sm:$0xff]  ;;  %v964_v22 = vor.u32 %v2162_v17, %v2161_v16 }
 0x2c8   : > { %923 = vmatmul.msk.bf16.gmra.mxu3 %vm423_vm5, %v916_v50  ;;  %v2152_v50 = vld [vmem:[#allocation77_spill] sm:$0xff] }
 0x2c9   : > { %v984_v52 = vor.u32 %v2152_v50, %v2151_v61  ;;  %v2164_v61 = vld [vmem:[#allocation65_spill] sm:$0xff] }
 0x2ca   : > { %v960_v50 = vor.u32 %v2164_v61, %v2163_v58  ;;  %v542_v58 = vmul.f32 0.025, %v1872_v48  ;;  %v544_v61 = vmul.f32 0.025, %v1882_v51 }
 0x2cb   : > { %662 = vmatpush.bf16.msrb.mxu1 %v984_v52 }
 0x2cf   : > { %663 = vmatpush.bf16.msrb.mxu1 %v980_v20 }
 0x2d8   : > { %924 = vmatmul.msk.bf16.gmra.mxu3 %vm423_vm5, %v920_v9  ;;  %v2156_v9 = vld [vmem:[#allocation73_spill] sm:$0xff] }
 0x2d9   : > { %v976_v11 = vor.u32 %v2156_v9, %v2155_v63 }
 0x2db   : > { %664 = vmatpush.bf16.msrb.mxu1 %v976_v11 }
 0x2df   : > { %665 = vmatpush.bf16.msrb.mxu1 %v972_v0 }
 0x2e3   : > { %666 = vmatpush.bf16.msrb.mxu1 %v968_v14 }
 0x2e7   : > { %667 = vmatpush.bf16.msrb.mxu1 %v964_v22 }
 0x2eb   : > { %668 = vmatpush.bf16.msrb.mxu1 %v960_v50 }
 0x32b   : > { %v518_v15 = vpop.f32.mrf.mxu3 }
 0x333   : > { %v520_v52 = vpop.f32.mrf.mxu3 }
 0x334   : > { %v538_v1 = vpack.c.bf16 %v520_v52, %v518_v15  ;;  %v543_v15 = vmul.f32 0.025, %v1875_v49 }
 0x336   : > { %650 = vmatmul.bf16.vlgmr.msrb.gmra.mxu0 %v538_v1 }
 0x33b   : > { %v523_v3 = vpop.f32.mrf.mxu3 }
 0x343   : > { %v525_v20 = vpop.f32.mrf.mxu3 }
 0x344   : > { %v540_v63 = vpack.c.bf16 %v525_v20, %v523_v3 }
 0x346   : > { %655 = vmatmul.bf16.gmra.mxu0 %v540_v63  ;;  %v545_v63 = vmul.f32 0.025, %v1885_v47 }
 0x34b   : > { %v528_v9 = vpop.f32.mrf.mxu3 }
 0x353   : > { %v530_v11 = vpop.f32.mrf.mxu3 }
 0x354   : > { %v539_v62 = vpack.c.bf16 %v530_v11, %v528_v9 }
 0x356   : > { %669 = vmatmul.bf16.vlgmr.msrb.gmra.mxu1 %v539_v62 }
 0x35b   : > { %v533_v12 = vpop.f32.mrf.mxu3 }
 0x363   : > { %v535_v0 = vpop.f32.mrf.mxu3 }
 0x364   : > { %v541_v60 = vpack.c.bf16 %v535_v0, %v533_v12 }
 0x366   : > { %674 = vmatmul.bf16.gmra.mxu1 %v541_v60 }
 0x3b3   : > { %v651_v13 = vpop.f32.mrf.mxu0 }
 0x3b4   : > { %v652_v1 = vadd.f32 %v651_v13, %v542_v58 }
 0x3bb   : > { %v653_v14 = vpop.f32.mrf.mxu0 }
 0x3bc   : > { %v654_v50 = vadd.f32 %v653_v14, %v543_v15 }
 0x3c3   : > { %v656_v22 = vpop.f32.mrf.mxu0 }
 0x3c4   : > { %v657_v3 = vadd.f32 %v656_v22, %v544_v61 }
 0x3cb   : > { %v658_v62 = vpop.f32.mrf.mxu0 }
 0x3cc   : > { %v659_v0 = vadd.f32 %v658_v62, %v545_v63 }
 0x3d3   : > { %v670_v16 = vpop.f32.mrf.mxu1 }
 0x3d4   : > { %v671_v9 = vadd.f32 %v670_v16, %v652_v1 }
 0x3d6   : > { %v680_v60 = vmul.f32 %v671_v9, %v1872_v48 }
 0x3db   : > { %v672_v17 = vpop.f32.mrf.mxu1 }
 0x3dc   : > { %v673_v20 = vadd.f32 %v672_v17, %v654_v50 }
 0x3de   : > { %v681_v12 = vmul.f32 %v673_v20, %v1875_v49 }
 0x3e0   : > { %v684_v19 = vadd.f32 %v681_v12, %v680_v60 }
 0x3e3   : > { %v675_v52 = vpop.f32.mrf.mxu1 }
 0x3e4   : > { %v676_v11 = vadd.f32 %v675_v52, %v657_v3 }
 0x3e6   : > { %v682_v8 = vmul.f32 %v676_v11, %v1882_v51 }
 0x3e8   : > { %v685_v13 = vadd.f32 %v684_v19, %v682_v8 }
 0x3eb   : > { %v677_v10 = vpop.f32.mrf.mxu1 }
 0x3ec   : > { %v678_v18 = vadd.f32 %v677_v10, %v659_v0 }
 0x3ee   : > { %v683_v14 = vmul.f32 %v678_v18, %v1885_v47 }
 0x3f0   : > { %v686_v22 = vadd.f32 %v685_v13, %v683_v14 }
 0x3f2   : > { %687 = vadd.xlane.f32.xlu0 %v686_v22 }
 0x465   : > { %v688_v17 = vpop.xlane.xlu0 %687 }
 0x466   : > { %v689_v15 = vrot.slane %v688_v17, 4 }
 0x468   : > { %v690_v16 = vadd.f32 %v689_v15, %v688_v17 }
 0x46a   : > { %v691_v58 = vrot.slane %v690_v16, 2 }
 0x46c   : > { %v692_v61 = vadd.f32 %v691_v58, %v690_v16 }
 0x46e   : > { %v693_v50 = vrot.slane %v692_v61, 1 }
 0x470   : > { %v694_v52 = vadd.f32 %v693_v50, %v692_v61 }
 0x472   : > { %1031 = vpush %v694_v52 }
 0x4a3   : > { %s1032_s14 = spop %1031 }
 0x4a4   : > { %v696_v10 = vstv %s1032_s14 }
 0x4a5   : > { %1169 = vrcp.f32 %v696_v10  ;;  %v708_v3 = vand.u32 2147483648, %v696_v10  ;;  %v706_v62 = vand.u32 2147483647, %v696_v10  ;;  %vm702_vm8 = vweird.f32 %v696_v10 }
 0x4a7   : > { %v709_v0 = vor.u32 1.1754944e-38, %v708_v3  ;;  %vm707_vm10 = vcmp.eq.f32.partialorder %v706_v62, 8.507059e+37 }
 0x4ab   : > { %v1170_v8 = vpop.eup %1169 }
 0x4ac   : > { %v698_v19 = vmul.f32 %v1170_v8, %v696_v10  ;;  %vm703_vm7 = vweird.f32 %v1170_v8 }
 0x4ad   : > { %vm704_vm9 = vmor %vm702_vm8, %vm703_vm7 }
 0x4ae   : > { %v699_v1 = vsub.f32 1.0, %v698_v19 }
 0x4b0   : > { %v700_v63 = vmul.f32 %v1170_v8, %v699_v1 }
 0x4b2   : > { %v701_v12 = vadd.f32 %v1170_v8, %v700_v63 }
 0x4b4   : > { %v705_v60 = vsel %vm704_vm9, %v1170_v8, %v701_v12 }
 0x4b5   : > { %v710_v14 = vsel %vm707_vm10, %v709_v0, %v705_v60 }
 0x4b6   : > { %v711_v13 = vmul.f32 %v1439_v54, %v710_v14 }
 0x4b8   : > { %v712_v22 = vsel %vm250_vm6, %v711_v13, 0.0 }
 0x4b9   : > { %v713_v17 = vmul.f32 %v712_v22, %v1872_v48  ;;  %v714_v15 = vmul.f32 %v712_v22, %v1875_v49  ;;  %v715_v16 = vmul.f32 %v712_v22, %v1882_v51  ;;  %v716_v58 = vmul.f32 %v712_v22, %v1885_v47 }
 0x4ba   : > { %v721_v61 = vmul.f32 %v712_v22, %v671_v9  ;;  %v722_v50 = vmul.f32 %v712_v22, %v673_v20  ;;  %v723_v52 = vmul.f32 %v712_v22, %v676_v11  ;;  %v724_v10 = vmul.f32 %v712_v22, %v678_v18 }
 0x4bb   : > { %v717_v8 = vadd.f32 %v1487_v4, %v713_v17   ;;  %v718_v19 = vadd.f32 %v1483_v5, %v714_v15   ;;  %v719_v1 = vadd.f32 %v1479_v6, %v715_v16   ;;  %v720_v3 = vadd.f32 %v1475_v7, %v716_v58  }
 0x4bc   : > { %v725_v53 = vsub.f32 %v1471_v53, %v721_v61   ;;  %v726_v56 = vsub.f32 %v1467_v56, %v722_v50   ;;  %v727_v59 = vsub.f32 %v1463_v59, %v723_v52   ;;  %v728_v55 = vsub.f32 %v1459_v55, %v724_v10  }
 0x4bd   :  { %748 = vst [vmem:[#allocation14] sm:$0xff] (%p1985_p1), %v717_v8 }
 0x4be   : > { %v729_v9 = vmul.f32 %v725_v53, %v725_v53  ;;  %v730_v20 = vmul.f32 %v726_v56, %v726_v56  ;;  %v731_v11 = vmul.f32 %v727_v59, %v727_v59  ;;  %v732_v63 = vmul.f32 %v728_v55, %v728_v55  ;;  %749 = vst [vmem:[#allocation14 + $0x8] sm:$0xff] (%p1985_p1), %v718_v19 }
 0x4bf   :  { %750 = vst [vmem:[#allocation14 + $0x10] sm:$0xff] (%p1985_p1), %v719_v1 }
 0x4c0   : > { %v733_v18 = vadd.f32 %v730_v20, %v729_v9  ;;  %751 = vst [vmem:[#allocation14 + $0x18] sm:$0xff] (%p1985_p1), %v720_v3 }
 0x4c1   :  { %764 = dma.vmem_to_hbm [thread:$0]  (%p1985_p1), %s757_s20, 512, %s759_s18, [#allocation4], %s1494_s9, %s1494_s9, %s1495_s10  }
 0x4c2   : > { %v734_v4 = vadd.f32 %v733_v18, %v731_v11 }
 0x4c4   : > { %v735_v62 = vadd.f32 %v734_v4, %v732_v63  ;;  %v2169_v4 = vmov %v717_v8 }
 0x4c6   : > { %736 = vadd.xlane.f32.xlu0 %v735_v62 }
 0x539   : > { %v737_v5 = vpop.xlane.xlu0 %736 }
 0x53a   : > { %v738_v6 = vrot.slane %v737_v5, 4 }
 0x53c   : > { %v739_v12 = vadd.f32 %v738_v6, %v737_v5  ;;  %v2167_v6 = vmov %v719_v1  ;;  %v2168_v5 = vmov %v718_v19 }
 0x53e   : > { %v740_v7 = vrot.slane %v739_v12, 2 }
 0x540   : > { %v741_v0 = vadd.f32 %v740_v7, %v739_v12  ;;  %v2166_v7 = vmov %v720_v3 }
 0x542   : > { %v742_v60 = vrot.slane %v741_v0, 1 }
 0x544   : > { %v743_v14 = vadd.f32 %v742_v60, %v741_v0 }
 0x546   : > { %1033 = vpush %v743_v14 }
 0x575   :  { %234 = sbr.rel (!%p1985_p1) target bundleno = 273 (0x111), region = 83 }
 0x577   : > { %s1034_s3 = spop %1033 }
 0x578   : > { %v745_v13 = vstv %s1034_s3 }
 0x579   : > { %v747_v54 = vsel %vm250_vm6, %v745_v13, %v1439_v54  }
 0x57a   :  { %1431 = dma.done.wait [#allocation4], 512  }
 0x57b   :  { %1432 = vsyncadd [#allocation4], 4294966784 }
 0x57c   :  { %769 = vsyncpa [#allocation3], 1 }
 0x57d   :  { %770 = vsyncpa [#allocation6], 1 }
 0x57e   :  { %771 = vsyncpa [#allocation9], 1 }
 0x57f   :  { %772 = vsyncpa [#allocation12], 1 }
 0x580   :  { %773 = vsyncpa [#allocation4], 1 }

</bundles_post_ra>
